<compile_context>
chip_gen: v7x
topology: tpu7x:2x2x1
jax: 0.10.0
libtpu: 0.0.40
codegen_flags: <defaults>
</compile_context>

<pallas_src>
import functools

import jax
import jax.numpy as jnp
from jax import lax
from jax.experimental import pallas as pl
from jax.experimental.pallas import tpu as pltpu


# --------------------------------------------------------------------------- #
# Kernel
# --------------------------------------------------------------------------- #
def _mlp_kernel(x_ref, w1_ref, b1_ref, w2_ref, b2_ref, w3_ref, b3_ref,
                w4_ref, b4_ref, o_ref, *, fused_input, bf16_epilogue, mxu_final):
    # ---- Layer 1: Linear(4, 64), f32 MXU (K = 4), feature-major output.
    if fused_input:
        # x_ref is the natural (TB, 4) batch-major tile; contract minor dims:
        # (64, 4) . (TB, 4)^T -> (64, TB).
        h = lax.dot_general(w1_ref[...], x_ref[...],
                            dimension_numbers=(((1,), (1,)), ((), ())),
                            preferred_element_type=jnp.float32)
    else:
        # Fallback path: x_ref is a pre-transposed (4, TB) tile.
        h = jnp.dot(w1_ref[...], x_ref[...], preferred_element_type=jnp.float32)

    def act(acc, b_ref, keep_f32=False):
        if bf16_epilogue:
            # v6e/v7x: bias-add + ReLU on packed bf16 vregs (VALU relief).
            return jnp.maximum(acc.astype(jnp.bfloat16) + b_ref[...], 0)
        h32 = jnp.maximum(acc + b_ref[...], 0.0)          # v5e: f32 VPU epilogue
        return h32 if keep_f32 else h32.astype(jnp.bfloat16)

    # ---- Layers 2-3: Linear(64, 64) + ReLU, bf16 MXU operands, f32 accumulate.
    h = act(h, b1_ref)                                                   # (64, TB)
    h = act(jnp.dot(w2_ref[...], h, preferred_element_type=jnp.float32), b2_ref)
    h = act(jnp.dot(w3_ref[...], h, preferred_element_type=jnp.float32), b3_ref,
            keep_f32=not mxu_final)

    # ---- Layer 4: Linear(64, 1).
    if mxu_final:
        # MXU has slack in the VALU-bound regime: (1, 64) @ (64, TB).
        y = jnp.dot(w4_ref[...], h, preferred_element_type=jnp.float32) + b4_ref[...]
    else:
        # v5e: VPU multiply + sublane (XLU) reduce instead of a 1-row matmul.
        y = jnp.sum(h * w4_ref[...], axis=0, keepdims=True) + b4_ref[...]

    o_ref[...] = y.astype(o_ref.dtype)                                   # (1, TB)


# --------------------------------------------------------------------------- #
# Wrapper
# --------------------------------------------------------------------------- #
def _round_up(n, m):
    return -(-n // m) * m


def _chip_kind():
    try:
        return jax.devices()[0].device_kind.lower()
    except Exception:
        return ""


def _default_config():
    kind = _chip_kind()
    newer = ("v6" in kind) or ("v7" in kind)   # bf16 VALU + plenty of MXU slack
    return dict(fused_input=True, bf16_epilogue=newer, mxu_final=newer,
                core_parallel=("v7" in kind))


def _prep_params(params, bf16_epilogue, mxu_final):
    """PyTorch nn.Linear layout in -> kernel layout (feature-major, chip-tuned)."""
    (w1, b1), (w2, b2), (w3, b3), (w4, b4) = params
    bdt = jnp.bfloat16 if bf16_epilogue else jnp.float32
    w1c = w1.astype(jnp.float32)                              # (64, 4)  f32 layer 1
    w2c = w2.astype(jnp.bfloat16)                             # (64, 64)
    w3c = w3.astype(jnp.bfloat16)                             # (64, 64)
    b1c = b1.astype(bdt).reshape(64, 1)
    b2c = b2.astype(bdt).reshape(64, 1)
    b3c = b3.astype(bdt).reshape(64, 1)
    if mxu_final:
        w4c = w4.astype(jnp.bfloat16).reshape(1, 64)          # MXU row
    else:
        w4c = w4.astype(jnp.float32).reshape(64, 1)           # VPU column
    b4c = b4.astype(jnp.float32).reshape(1, 1)
    return (w1c, b1c, w2c, b2c, w3c, b3c, w4c, b4c)


def _attempt(x, params, *, tb_eff, fused_input, bf16_epilogue, mxu_final,
             core_parallel):
    pf = _prep_params(params, bf16_epilogue, mxu_final)
    Bk = x.shape[0]
    grid_len = pl.cdiv(Bk, tb_eff)

    if fused_input:
        x_in, x_spec = x, pl.BlockSpec((tb_eff, 4), lambda i: (i, 0))
    else:
        # Conservative fallback: one wrapper-side transpose pass (extra HBM
        # traffic, but the layout every Mosaic toolchain lowers cleanly).
        x_in, x_spec = x.T, pl.BlockSpec((4, tb_eff), lambda i: (0, i))

    resident = lambda a: pl.BlockSpec(a.shape, lambda i: (0, 0))  # VMEM-resident
    dim_sem = ((pltpu.CORE_PARALLEL,) if (core_parallel and grid_len >= 2)
               else ("parallel",))

    kern = functools.partial(_mlp_kernel, fused_input=fused_input,
                             bf16_epilogue=bf16_epilogue, mxu_final=mxu_final)
    return pl.pallas_call(
        kern,
        out_shape=jax.ShapeDtypeStruct((1, Bk), jnp.float32),
        grid=(grid_len,),
        in_specs=[x_spec] + [resident(p) for p in pf],
        out_specs=pl.BlockSpec((1, tb_eff), lambda i: (0, i)),   # lane-dense store
        compiler_params=pltpu.CompilerParams(
            dimension_semantics=dim_sem,
            vmem_limit_bytes=32 * 1024 * 1024),
    )(x_in, *pf)


_ACTIVE = {"config": None}   # config actually used (set on first successful call)


def net_forward(x, params, *, tb=4096):
    """Forward pass of Net.  `params` uses the PyTorch nn.Linear convention:
    w: (out_features, in_features), b: (out_features,)."""
    x = x.astype(jnp.float32)                 # matches `x = x.to(torch.float32)`
    B = int(x.shape[0])

    # Large batch tile (multiple of 128) amortizes grid-step overhead; clamp
    # only shrinks it for small batches.
    tb_eff = min(tb, _round_up(B, 128))
    if B < tb_eff:                            # tiny batch: pad to one tile (cheap)
        x = jnp.pad(x, ((0, tb_eff - B), (0, 0)))
    Bk = int(x.shape[0])
    # For large B the ragged final tile is handled by Pallas boundary masking
    # (garbage reads stay in their own batch columns, OOB writes are dropped).

    tuned = _ACTIVE["config"] or _default_config()
    conservative = dict(fused_input=False, bf16_epilogue=False,
                        mxu_final=False, core_parallel=False)
    candidates = [tuned] if tuned == conservative else [tuned, conservative]

    last_err = None
    for cfg in candidates:
        try:
            yT = _attempt(x, params, tb_eff=tb_eff, **cfg)
            yT.block_until_ready()
            _ACTIVE["config"] = dict(cfg)
            return yT.reshape(Bk, 1)[:B]      # (1, Bk) -> (B, 1): metadata only
        except Exception as err:              # lowering failure -> fallback
            last_err = err
    raise last_err


# --------------------------------------------------------------------------- #
# Parameters & references
# --------------------------------------------------------------------------- #
def init_params(key):
    """nn.Linear default init U(-1/sqrt(fan_in), +1/sqrt(fan_in)), PyTorch layout."""
    dims = [(4, 64), (64, 64), (64, 64), (64, 1)]
    params = []
    for fan_in, fan_out in dims:
        key, kw, kb = jax.random.split(key, 3)
        bound = 1.0 / jnp.sqrt(float(fan_in))
        w = jax.random.uniform(kw, (fan_out, fan_in), jnp.float32, -bound, bound)
        b = jax.random.uniform(kb, (fan_out,), jnp.float32, -bound, bound)
        params.append((w, b))
    return params


def reference_forward_f32(x, params):
    """Exact f32 reference (same math as the PyTorch module)."""
    h = x.astype(jnp.float32)
    for i, (w, b) in enumerate(params):
        h = h @ w.T + b
        if i < len(params) - 1:
            h = jnp.maximum(h, 0.0)
    return h


def reference_forward_matched(x, params, *, bf16_epilogue, mxu_final):
    """Plain-JAX reference mirroring the kernel's precision choices."""
    (w1, b1), (w2, b2), (w3, b3), (w4, b4) = params
    f32, bf16 = jnp.float32, jnp.bfloat16
    h = jnp.dot(x.astype(f32), w1.T, precision=lax.Precision.HIGHEST)   # f32 layer 1

    def act(a, b, keep_f32=False):
        if bf16_epilogue:
            return jnp.maximum(a.astype(bf16) + b.astype(bf16), 0)
        h32 = jnp.maximum(a + b, 0.0)
        return h32 if keep_f32 else h32.astype(bf16)

    h = act(h, b1)
    h = act(jnp.dot(h, w2.T.astype(bf16), preferred_element_type=f32), b2)
    h = act(jnp.dot(h, w3.T.astype(bf16), preferred_element_type=f32), b3,
            keep_f32=not mxu_final)
    if mxu_final:
        return jnp.dot(h, w4.T.astype(bf16), preferred_element_type=f32) + b4
    return jnp.sum(h * w4.astype(f32), axis=-1, keepdims=True) + b4


# --------------------------------------------------------------------------- #
# Demo / self-check
# --------------------------------------------------------------------------- #
if __name__ == "__main__":
    key = jax.random.PRNGKey(0)
    kp, k1, k2, k3 = jax.random.split(key, 4)
    params = init_params(kp)

    cases = [
        (8, 4096, k1),     # tiny batch (original LQR control use case)
        (300, 4096, k2),   # single (slightly padded) tile
        (1157, 512, k3),   # multi-tile grid + ragged (masked) final tile
    ]
    for B, tb, kx in cases:
        x = jax.random.normal(kx, (B, 4), jnp.float32)

        y = jax.block_until_ready(net_forward(x, params, tb=tb))
        assert y.shape == (B, 1)

        cfg = _ACTIVE["config"]
        y_match = reference_forward_matched(
            x, params, bf16_epilogue=cfg["bf16_epilogue"], mxu_final=cfg["mxu_final"])
        assert jnp.allclose(y, y_match, atol=1e-2, rtol=1e-2), \
            f"B={B}: mismatch vs matched-precision reference"

        y_f32 = reference_forward_f32(x, params)
        assert jnp.allclose(y, y_f32, atol=5e-2, rtol=5e-2), \
            f"B={B}: mismatch vs f32 reference"

    print("KERNEL_OK")
</pallas_src>

<mosaic_0001>
module attributes {stable_mosaic.version = 11 : i64} {
  func.func @_mlp_kernel(%arg0: i32, %arg1: memref<128x4xf32, #tpu.memory_space<vmem>>, %arg2: memref<64x4xf32, #tpu.memory_space<vmem>>, %arg3: memref<64x1xf32, #tpu.memory_space<vmem>>, %arg4: memref<64x64xbf16, #tpu.memory_space<vmem>>, %arg5: memref<64x1xf32, #tpu.memory_space<vmem>>, %arg6: memref<64x64xbf16, #tpu.memory_space<vmem>>, %arg7: memref<64x1xf32, #tpu.memory_space<vmem>>, %arg8: memref<64x1xf32, #tpu.memory_space<vmem>>, %arg9: memref<1x1xf32, #tpu.memory_space<vmem>>, %arg10: memref<1x128xf32, #tpu.memory_space<vmem>>) attributes {dimension_semantics = [#tpu.dimension_semantics<parallel>], iteration_bounds = array<i64: 1>, scalar_prefetch = 0 : i64, scratch_operands = 0 : i64, tpu.core_type = #tpu.core_type<tc>, window_params = [{transform_indices = @transform_0, window_bounds = array<i64: 128, 4>}, {pipeline_mode = #tpu.pipeline_mode<synchronous>, transform_indices = @transform_1, window_bounds = array<i64: 64, 4>}, {pipeline_mode = #tpu.pipeline_mode<synchronous>, transform_indices = @transform_2, window_bounds = array<i64: 64, 1>}, {pipeline_mode = #tpu.pipeline_mode<synchronous>, transform_indices = @transform_3, window_bounds = array<i64: 64, 64>}, {pipeline_mode = #tpu.pipeline_mode<synchronous>, transform_indices = @transform_4, window_bounds = array<i64: 64, 1>}, {pipeline_mode = #tpu.pipeline_mode<synchronous>, transform_indices = @transform_5, window_bounds = array<i64: 64, 64>}, {pipeline_mode = #tpu.pipeline_mode<synchronous>, transform_indices = @transform_6, window_bounds = array<i64: 64, 1>}, {pipeline_mode = #tpu.pipeline_mode<synchronous>, transform_indices = @transform_7, window_bounds = array<i64: 64, 1>}, {pipeline_mode = #tpu.pipeline_mode<synchronous>, transform_indices = @transform_8, window_bounds = array<i64: 1, 1>}, {transform_indices = @transform_9, window_bounds = array<i64: 1, 128>}]} {
    %c0 = arith.constant 0 : index
    %c0_0 = arith.constant 0 : index
    %0 = vector.load %arg2[%c0, %c0_0] : memref<64x4xf32, #tpu.memory_space<vmem>>, vector<64x4xf32>
    %c0_1 = arith.constant 0 : index
    %c0_2 = arith.constant 0 : index
    %1 = vector.load %arg1[%c0_1, %c0_2] : memref<128x4xf32, #tpu.memory_space<vmem>>, vector<128x4xf32>
    %cst = arith.constant dense<0.000000e+00> : vector<64x128xf32>
    %2 = tpu.matmul %0, %1, %cst {dimension_numbers = #tpu.dot_dimension_numbers<[1], [1], [0], [0], [0, 0, 1, 0], [], []>} : vector<64x4xf32>, vector<128x4xf32>, vector<64x128xf32> -> vector<64x128xf32>
    %c0_3 = arith.constant 0 : index
    %c0_4 = arith.constant 0 : index
    %3 = vector.load %arg3[%c0_3, %c0_4] : memref<64x1xf32, #tpu.memory_space<vmem>>, vector<64x1xf32>
    %4 = vector.broadcast %3 : vector<64x1xf32> to vector<64x128xf32>
    %5 = arith.addf %2, %4 : vector<64x128xf32>
    %cst_5 = arith.constant 0.000000e+00 : f32
    %6 = vector.broadcast %cst_5 : f32 to vector<64x128xf32>
    %7 = arith.maximumf %5, %6 : vector<64x128xf32>
    %8 = arith.truncf %7 : vector<64x128xf32> to vector<64x128xbf16>
    %c0_6 = arith.constant 0 : index
    %c0_7 = arith.constant 0 : index
    %9 = vector.load %arg4[%c0_6, %c0_7] : memref<64x64xbf16, #tpu.memory_space<vmem>>, vector<64x64xbf16>
    %cst_8 = arith.constant dense<0.000000e+00> : vector<64x128xf32>
    %10 = tpu.matmul %9, %8, %cst_8 {dimension_numbers = #tpu.dot_dimension_numbers<[1], [0], [0], [1], [0, 0, 1, 1], [], []>} : vector<64x64xbf16>, vector<64x128xbf16>, vector<64x128xf32> -> vector<64x128xf32>
    %c0_9 = arith.constant 0 : index
    %c0_10 = arith.constant 0 : index
    %11 = vector.load %arg5[%c0_9, %c0_10] : memref<64x1xf32, #tpu.memory_space<vmem>>, vector<64x1xf32>
    %12 = vector.broadcast %11 : vector<64x1xf32> to vector<64x128xf32>
    %13 = arith.addf %10, %12 : vector<64x128xf32>
    %cst_11 = arith.constant 0.000000e+00 : f32
    %14 = vector.broadcast %cst_11 : f32 to vector<64x128xf32>
    %15 = arith.maximumf %13, %14 : vector<64x128xf32>
    %16 = arith.truncf %15 : vector<64x128xf32> to vector<64x128xbf16>
    %c0_12 = arith.constant 0 : index
    %c0_13 = arith.constant 0 : index
    %17 = vector.load %arg6[%c0_12, %c0_13] : memref<64x64xbf16, #tpu.memory_space<vmem>>, vector<64x64xbf16>
    %cst_14 = arith.constant dense<0.000000e+00> : vector<64x128xf32>
    %18 = tpu.matmul %17, %16, %cst_14 {dimension_numbers = #tpu.dot_dimension_numbers<[1], [0], [0], [1], [0, 0, 1, 1], [], []>} : vector<64x64xbf16>, vector<64x128xbf16>, vector<64x128xf32> -> vector<64x128xf32>
    %c0_15 = arith.constant 0 : index
    %c0_16 = arith.constant 0 : index
    %19 = vector.load %arg7[%c0_15, %c0_16] : memref<64x1xf32, #tpu.memory_space<vmem>>, vector<64x1xf32>
    %20 = vector.broadcast %19 : vector<64x1xf32> to vector<64x128xf32>
    %21 = arith.addf %18, %20 : vector<64x128xf32>
    %cst_17 = arith.constant 0.000000e+00 : f32
    %22 = vector.broadcast %cst_17 : f32 to vector<64x128xf32>
    %23 = arith.maximumf %21, %22 : vector<64x128xf32>
    %c0_18 = arith.constant 0 : index
    %c0_19 = arith.constant 0 : index
    %24 = vector.load %arg8[%c0_18, %c0_19] : memref<64x1xf32, #tpu.memory_space<vmem>>, vector<64x1xf32>
    %25 = vector.broadcast %24 : vector<64x1xf32> to vector<64x128xf32>
    %26 = arith.mulf %23, %25 : vector<64x128xf32>
    %cst_20 = arith.constant dense<0.000000e+00> : vector<128xf32>
    %27 = vector.multi_reduction <add>, %26, %cst_20 [0] : vector<64x128xf32> to vector<128xf32>
    %28 = vector.shape_cast %27 : vector<128xf32> to vector<1x128xf32>
    %c0_21 = arith.constant 0 : index
    %c0_22 = arith.constant 0 : index
    %29 = vector.load %arg9[%c0_21, %c0_22] : memref<1x1xf32, #tpu.memory_space<vmem>>, vector<1x1xf32>
    %30 = vector.broadcast %29 : vector<1x1xf32> to vector<1x128xf32>
    %31 = arith.addf %28, %30 : vector<1x128xf32>
    %c0_23 = arith.constant 0 : index
    %c0_24 = arith.constant 0 : index
    %32 = vector.load %arg10[%c0_23, %c0_24] : memref<1x128xf32, #tpu.memory_space<vmem>>, vector<1x128xf32>
    tpu.vector_store %arg10[%c0_23, %c0_24], %31 {strides = array<i32>} : memref<1x128xf32, #tpu.memory_space<vmem>>, vector<1x128xf32>,
    return
  }
  func.func @transform_0(%arg0: i32) -> (i32, i32) {
    %c0_i32 = arith.constant 0 : i32
    %c0_i32_0 = arith.constant 0 : i32
    return %arg0, %c0_i32 : i32, i32
  }
  func.func @transform_1(%arg0: i32) -> (i32, i32) {
    %c0_i32 = arith.constant 0 : i32
    %c0_i32_0 = arith.constant 0 : i32
    %c0_i32_1 = arith.constant 0 : i32
    return %c0_i32, %c0_i32_0 : i32, i32
  }
  func.func @transform_2(%arg0: i32) -> (i32, i32) {
    %c0_i32 = arith.constant 0 : i32
    %c0_i32_0 = arith.constant 0 : i32
    %c0_i32_1 = arith.constant 0 : i32
    return %c0_i32, %c0_i32_0 : i32, i32
  }
  func.func @transform_3(%arg0: i32) -> (i32, i32) {
    %c0_i32 = arith.constant 0 : i32
    %c0_i32_0 = arith.constant 0 : i32
    %c0_i32_1 = arith.constant 0 : i32
    return %c0_i32, %c0_i32_0 : i32, i32
  }
  func.func @transform_4(%arg0: i32) -> (i32, i32) {
    %c0_i32 = arith.constant 0 : i32
    %c0_i32_0 = arith.constant 0 : i32
    %c0_i32_1 = arith.constant 0 : i32
    return %c0_i32, %c0_i32_0 : i32, i32
  }
  func.func @transform_5(%arg0: i32) -> (i32, i32) {
    %c0_i32 = arith.constant 0 : i32
    %c0_i32_0 = arith.constant 0 : i32
    %c0_i32_1 = arith.constant 0 : i32
    return %c0_i32, %c0_i32_0 : i32, i32
  }
  func.func @transform_6(%arg0: i32) -> (i32, i32) {
    %c0_i32 = arith.constant 0 : i32
    %c0_i32_0 = arith.constant 0 : i32
    %c0_i32_1 = arith.constant 0 : i32
    return %c0_i32, %c0_i32_0 : i32, i32
  }
  func.func @transform_7(%arg0: i32) -> (i32, i32) {
    %c0_i32 = arith.constant 0 : i32
    %c0_i32_0 = arith.constant 0 : i32
    %c0_i32_1 = arith.constant 0 : i32
    return %c0_i32, %c0_i32_0 : i32, i32
  }
  func.func @transform_8(%arg0: i32) -> (i32, i32) {
    %c0_i32 = arith.constant 0 : i32
    %c0_i32_0 = arith.constant 0 : i32
    %c0_i32_1 = arith.constant 0 : i32
    return %c0_i32, %c0_i32_0 : i32, i32
  }
  func.func @transform_9(%arg0: i32) -> (i32, i32) {
    %c0_i32 = arith.constant 0 : i32
    %c0_i32_0 = arith.constant 0 : i32
    return %c0_i32, %arg0 : i32, i32
  }
}

module attributes {stable_mosaic.version = 11 : i64} {
  func.func @_mlp_kernel(%arg0: i32, %arg1: memref<4x128xf32, #tpu.memory_space<vmem>>, %arg2: memref<64x4xf32, #tpu.memory_space<vmem>>, %arg3: memref<64x1xf32, #tpu.memory_space<vmem>>, %arg4: memref<64x64xbf16, #tpu.memory_space<vmem>>, %arg5: memref<64x1xf32, #tpu.memory_space<vmem>>, %arg6: memref<64x64xbf16, #tpu.memory_space<vmem>>, %arg7: memref<64x1xf32, #tpu.memory_space<vmem>>, %arg8: memref<64x1xf32, #tpu.memory_space<vmem>>, %arg9: memref<1x1xf32, #tpu.memory_space<vmem>>, %arg10: memref<1x128xf32, #tpu.memory_space<vmem>>) attributes {dimension_semantics = [#tpu.dimension_semantics<parallel>], iteration_bounds = array<i64: 1>, scalar_prefetch = 0 : i64, scratch_operands = 0 : i64, tpu.core_type = #tpu.core_type<tc>, window_params = [{transform_indices = @transform_0, window_bounds = array<i64: 4, 128>}, {pipeline_mode = #tpu.pipeline_mode<synchronous>, transform_indices = @transform_1, window_bounds = array<i64: 64, 4>}, {pipeline_mode = #tpu.pipeline_mode<synchronous>, transform_indices = @transform_2, window_bounds = array<i64: 64, 1>}, {pipeline_mode = #tpu.pipeline_mode<synchronous>, transform_indices = @transform_3, window_bounds = array<i64: 64, 64>}, {pipeline_mode = #tpu.pipeline_mode<synchronous>, transform_indices = @transform_4, window_bounds = array<i64: 64, 1>}, {pipeline_mode = #tpu.pipeline_mode<synchronous>, transform_indices = @transform_5, window_bounds = array<i64: 64, 64>}, {pipeline_mode = #tpu.pipeline_mode<synchronous>, transform_indices = @transform_6, window_bounds = array<i64: 64, 1>}, {pipeline_mode = #tpu.pipeline_mode<synchronous>, transform_indices = @transform_7, window_bounds = array<i64: 64, 1>}, {pipeline_mode = #tpu.pipeline_mode<synchronous>, transform_indices = @transform_8, window_bounds = array<i64: 1, 1>}, {transform_indices = @transform_9, window_bounds = array<i64: 1, 128>}]} {
    %c0 = arith.constant 0 : index
    %c0_0 = arith.constant 0 : index
    %0 = vector.load %arg2[%c0, %c0_0] : memref<64x4xf32, #tpu.memory_space<vmem>>, vector<64x4xf32>
    %c0_1 = arith.constant 0 : index
    %c0_2 = arith.constant 0 : index
    %1 = vector.load %arg1[%c0_1, %c0_2] : memref<4x128xf32, #tpu.memory_space<vmem>>, vector<4x128xf32>
    %cst = arith.constant dense<0.000000e+00> : vector<64x128xf32>
    %2 = tpu.matmul %0, %1, %cst {dimension_numbers = #tpu.dot_dimension_numbers<[1], [0], [0], [1], [0, 0, 1, 1], [], []>} : vector<64x4xf32>, vector<4x128xf32>, vector<64x128xf32> -> vector<64x128xf32>
    %c0_3 = arith.constant 0 : index
    %c0_4 = arith.constant 0 : index
    %3 = vector.load %arg3[%c0_3, %c0_4] : memref<64x1xf32, #tpu.memory_space<vmem>>, vector<64x1xf32>
    %4 = vector.broadcast %3 : vector<64x1xf32> to vector<64x128xf32>
    %5 = arith.addf %2, %4 : vector<64x128xf32>
    %cst_5 = arith.constant 0.000000e+00 : f32
    %6 = vector.broadcast %cst_5 : f32 to vector<64x128xf32>
    %7 = arith.maximumf %5, %6 : vector<64x128xf32>
    %8 = arith.truncf %7 : vector<64x128xf32> to vector<64x128xbf16>
    %c0_6 = arith.constant 0 : index
    %c0_7 = arith.constant 0 : index
    %9 = vector.load %arg4[%c0_6, %c0_7] : memref<64x64xbf16, #tpu.memory_space<vmem>>, vector<64x64xbf16>
    %cst_8 = arith.constant dense<0.000000e+00> : vector<64x128xf32>
    %10 = tpu.matmul %9, %8, %cst_8 {dimension_numbers = #tpu.dot_dimension_numbers<[1], [0], [0], [1], [0, 0, 1, 1], [], []>} : vector<64x64xbf16>, vector<64x128xbf16>, vector<64x128xf32> -> vector<64x128xf32>
    %c0_9 = arith.constant 0 : index
    %c0_10 = arith.constant 0 : index
    %11 = vector.load %arg5[%c0_9, %c0_10] : memref<64x1xf32, #tpu.memory_space<vmem>>, vector<64x1xf32>
    %12 = vector.broadcast %11 : vector<64x1xf32> to vector<64x128xf32>
    %13 = arith.addf %10, %12 : vector<64x128xf32>
    %cst_11 = arith.constant 0.000000e+00 : f32
    %14 = vector.broadcast %cst_11 : f32 to vector<64x128xf32>
    %15 = arith.maximumf %13, %14 : vector<64x128xf32>
    %16 = arith.truncf %15 : vector<64x128xf32> to vector<64x128xbf16>
    %c0_12 = arith.constant 0 : index
    %c0_13 = arith.constant 0 : index
    %17 = vector.load %arg6[%c0_12, %c0_13] : memref<64x64xbf16, #tpu.memory_space<vmem>>, vector<64x64xbf16>
    %cst_14 = arith.constant dense<0.000000e+00> : vector<64x128xf32>
    %18 = tpu.matmul %17, %16, %cst_14 {dimension_numbers = #tpu.dot_dimension_numbers<[1], [0], [0], [1], [0, 0, 1, 1], [], []>} : vector<64x64xbf16>, vector<64x128xbf16>, vector<64x128xf32> -> vector<64x128xf32>
    %c0_15 = arith.constant 0 : index
    %c0_16 = arith.constant 0 : index
    %19 = vector.load %arg7[%c0_15, %c0_16] : memref<64x1xf32, #tpu.memory_space<vmem>>, vector<64x1xf32>
    %20 = vector.broadcast %19 : vector<64x1xf32> to vector<64x128xf32>
    %21 = arith.addf %18, %20 : vector<64x128xf32>
    %cst_17 = arith.constant 0.000000e+00 : f32
    %22 = vector.broadcast %cst_17 : f32 to vector<64x128xf32>
    %23 = arith.maximumf %21, %22 : vector<64x128xf32>
    %c0_18 = arith.constant 0 : index
    %c0_19 = arith.constant 0 : index
    %24 = vector.load %arg8[%c0_18, %c0_19] : memref<64x1xf32, #tpu.memory_space<vmem>>, vector<64x1xf32>
    %25 = vector.broadcast %24 : vector<64x1xf32> to vector<64x128xf32>
    %26 = arith.mulf %23, %25 : vector<64x128xf32>
    %cst_20 = arith.constant dense<0.000000e+00> : vector<128xf32>
    %27 = vector.multi_reduction <add>, %26, %cst_20 [0] : vector<64x128xf32> to vector<128xf32>
    %28 = vector.shape_cast %27 : vector<128xf32> to vector<1x128xf32>
    %c0_21 = arith.constant 0 : index
    %c0_22 = arith.constant 0 : index
    %29 = vector.load %arg9[%c0_21, %c0_22] : memref<1x1xf32, #tpu.memory_space<vmem>>, vector<1x1xf32>
    %30 = vector.broadcast %29 : vector<1x1xf32> to vector<1x128xf32>
    %31 = arith.addf %28, %30 : vector<1x128xf32>
    %c0_23 = arith.constant 0 : index
    %c0_24 = arith.constant 0 : index
    %32 = vector.load %arg10[%c0_23, %c0_24] : memref<1x128xf32, #tpu.memory_space<vmem>>, vector<1x128xf32>
    tpu.vector_store %arg10[%c0_23, %c0_24], %31 {strides = array<i32>} : memref<1x128xf32, #tpu.memory_space<vmem>>, vector<1x128xf32>,
    return
  }
  func.func @transform_0(%arg0: i32) -> (i32, i32) {
    %c0_i32 = arith.constant 0 : i32
    %c0_i32_0 = arith.constant 0 : i32
    return %c0_i32, %arg0 : i32, i32
  }
  func.func @transform_1(%arg0: i32) -> (i32, i32) {
    %c0_i32 = arith.constant 0 : i32
    %c0_i32_0 = arith.constant 0 : i32
    %c0_i32_1 = arith.constant 0 : i32
    return %c0_i32, %c0_i32_0 : i32, i32
  }
  func.func @transform_2(%arg0: i32) -> (i32, i32) {
    %c0_i32 = arith.constant 0 : i32
    %c0_i32_0 = arith.constant 0 : i32
    %c0_i32_1 = arith.constant 0 : i32
    return %c0_i32, %c0_i32_0 : i32, i32
  }
  func.func @transform_3(%arg0: i32) -> (i32, i32) {
    %c0_i32 = arith.constant 0 : i32
    %c0_i32_0 = arith.constant 0 : i32
    %c0_i32_1 = arith.constant 0 : i32
    return %c0_i32, %c0_i32_0 : i32, i32
  }
  func.func @transform_4(%arg0: i32) -> (i32, i32) {
    %c0_i32 = arith.constant 0 : i32
    %c0_i32_0 = arith.constant 0 : i32
    %c0_i32_1 = arith.constant 0 : i32
    return %c0_i32, %c0_i32_0 : i32, i32
  }
  func.func @transform_5(%arg0: i32) -> (i32, i32) {
    %c0_i32 = arith.constant 0 : i32
    %c0_i32_0 = arith.constant 0 : i32
    %c0_i32_1 = arith.constant 0 : i32
    return %c0_i32, %c0_i32_0 : i32, i32
  }
  func.func @transform_6(%arg0: i32) -> (i32, i32) {
    %c0_i32 = arith.constant 0 : i32
    %c0_i32_0 = arith.constant 0 : i32
    %c0_i32_1 = arith.constant 0 : i32
    return %c0_i32, %c0_i32_0 : i32, i32
  }
  func.func @transform_7(%arg0: i32) -> (i32, i32) {
    %c0_i32 = arith.constant 0 : i32
    %c0_i32_0 = arith.constant 0 : i32
    %c0_i32_1 = arith.constant 0 : i32
    return %c0_i32, %c0_i32_0 : i32, i32
  }
  func.func @transform_8(%arg0: i32) -> (i32, i32) {
    %c0_i32 = arith.constant 0 : i32
    %c0_i32_0 = arith.constant 0 : i32
    %c0_i32_1 = arith.constant 0 : i32
    return %c0_i32, %c0_i32_0 : i32, i32
  }
  func.func @transform_9(%arg0: i32) -> (i32, i32) {
    %c0_i32 = arith.constant 0 : i32
    %c0_i32_0 = arith.constant 0 : i32
    return %c0_i32, %arg0 : i32, i32
  }
}

</mosaic_0001>

<bundles_post_ra>
// kernel: tpu_custom_call.1
= control target key start
LH: loop header
LB: loop body
LE: loop exit
PB: predicated region body
PF: predicated region fallthrough
CT: control target
= control target key end

     0   :  { %s1273_s0 = inlined_call_operand.vmem [shape: f32[128,4], index: 0, kind: input, shape index: {}]   ;;  %s1274_s1 = inlined_call_operand.vmem [shape: f32[64,4], index: 1, kind: input, shape index: {}]   ;;  %s1275_s2 = inlined_call_operand.vmem [shape: f32[64,1], index: 2, kind: input, shape index: {}]   ;;  %s1276_s3 = inlined_call_operand.vmem [shape: bf16[64,64], index: 3, kind: input, shape index: {}]   ;;  %s1277_s4 = inlined_call_operand.vmem [shape: f32[64,1], index: 4, kind: input, shape index: {}]   ;;  %s1278_s5 = inlined_call_operand.vmem [shape: bf16[64,64], index: 5, kind: input, shape index: {}]   ;;  %s1279_s6 = inlined_call_operand.vmem [shape: f32[64,1], index: 6, kind: input, shape index: {}]   ;;  %s1280_s7 = inlined_call_operand.vmem [shape: f32[64,1], index: 7, kind: input, shape index: {}]   ;;  %s1281_s8 = inlined_call_operand.<no memory space> [shape: f32[1,1], index: 8, kind: input, shape index: {}]   ;;  %s1282_s9 = inlined_call_operand.hbm [shape: f32[1,128], index: 9, kind: output, shape index: {}]  }
   0x1   :  { %v14_v0 = vstv %s1281_s8 }
   0x2   :  { %15 = vst [vmem:[#allocation2] sm:$0x1] %v14_v0 }
   0x3   :  { %v44_v1 = vld [vmem:[%s1273_s0] sm:$0xff]  ;;  %v45_v2 = vld [vmem:[%s1273_s0 + $0x8] sm:$0xff]  ;;  %vm108_vm0 = vcmask 31744   ;;  %v46_v3 = vld [vmem:[%s1273_s0 + $0x10] sm:$0xff]  ;;  %v960_v7 = vmov 0  }
   0x4   :  { %v876_v4 = vpack.c.bf16 %v45_v2, %v44_v1  ;;  %vm1026_vm1 = vmpackc.low %vm108_vm0, %vm108_vm0  ;;  %v47_v6 = vld [vmem:[%s1273_s0 + $0x18] sm:$0xff]  ;;  %926 = vset.pattern.permute.xlu0 %v960_v7  ;;  %927 = vset.pattern.permute.xlu1 %v960_v7  ;;  %v36_v9 = vld [vmem:[%s1274_s1] sm:$0xff] }
   0x5   :  { %v882_v8 = vpack.c.bf16 %v47_v6, %v46_v3  ;;  %v48_v10 = vld [vmem:[%s1273_s0 + $0x20] sm:$0xff]  ;;  %v49_v11 = vld [vmem:[%s1273_s0 + $0x28] sm:$0xff]  ;;  %832 = vmatprep.mubr.msk.f32.mxu0 %vm108_vm0, %v36_v9  ;;  %v62_v14 = vld [vmem:[%s1275_s2 + $0x10] sm:$0xff] }
   0x6   :  { %878 = vmatprep.subr.msk.bf16.mxu0 %vm1026_vm1, %v876_v4  ;;  %v60_v12 = vld [vmem:[%s1275_s2] sm:$0xff]  ;;  %v888_v13 = vpack.c.bf16 %v49_v11, %v48_v10  ;;  %v61_v15 = vld [vmem:[%s1275_s2 + $0x8] sm:$0xff]  ;;  %80 = vperm.xlu1 %927, %v62_v14   ;;  %v63_v16 = vld [vmem:[%s1275_s2 + $0x18] sm:$0xff] }
   0x7   :  { %881 = vmatpush3.bf16.xpose.msk.msra.mxu0 %vm1026_vm1, %v876_v4  ;;  %70 = vperm.xlu0 %926, %v60_v12   ;;  %v50_v17 = vld [vmem:[%s1273_s0 + $0x30] sm:$0xff]  ;;  %v51_v18 = vld [vmem:[%s1273_s0 + $0x38] sm:$0xff]  ;;  %v64_v19 = vld [vmem:[%s1275_s2 + $0x20] sm:$0xff] }
   0x8   :  { %884 = vmatprep.subr.msk.bf16.mxu0 %vm1026_vm1, %v882_v8  ;;  %v65_v20 = vld [vmem:[%s1275_s2 + $0x28] sm:$0xff]  ;;  %v894_v21 = vpack.c.bf16 %v51_v18, %v50_v17  ;;  %v66_v22 = vld [vmem:[%s1275_s2 + $0x30] sm:$0xff]  ;;  %v67_v23 = vld [vmem:[%s1275_s2 + $0x38] sm:$0xff] }
   0x9   :  { %v52_v24 = vld [vmem:[%s1273_s0 + $0x40] sm:$0xff]  ;;  %v53_v25 = vld [vmem:[%s1273_s0 + $0x48] sm:$0xff] }
   0xa   :  { %85 = vperm.xlu1 %927, %v63_v16   ;;  %v306_v26 = vld [vmem:[%s1277_s4] sm:$0xff]  ;;  %v307_v27 = vld [vmem:[%s1277_s4 + $0x8] sm:$0xff] }
   0xb   :  { %75 = vperm.xlu0 %926, %v61_v15  }
   0xe   :  { %95 = vperm.xlu1 %927, %v65_v20  }
   0xf   :  { %887 = vmatpush3.bf16.xpose.msk.msra.mxu0 %vm1026_vm1, %v882_v8  ;;  %90 = vperm.xlu0 %926, %v64_v19  }
  0x10   :  { %890 = vmatprep.subr.msk.bf16.mxu0 %vm1026_vm1, %v888_v13 }
  0x12   :  { %105 = vperm.xlu1 %927, %v67_v23  }
  0x13   :  { %100 = vperm.xlu0 %926, %v66_v22  }
  0x17   :  { %893 = vmatpush3.bf16.xpose.msk.msra.mxu0 %vm1026_vm1, %v888_v13 }
  0x18   :  { %896 = vmatprep.subr.msk.bf16.mxu0 %vm1026_vm1, %v894_v21 }
  0x19   :  { %16 = vsyncpa [#allocation4], 0  ;;  %v900_v28 = vpack.c.bf16 %v53_v25, %v52_v24  ;;  %316 = vperm.xlu0 %926, %v306_v26   ;;  %v308_v29 = vld [vmem:[%s1277_s4 + $0x10] sm:$0xff]  ;;  %321 = vperm.xlu1 %927, %v307_v27   ;;  %v309_v30 = vld [vmem:[%s1277_s4 + $0x18] sm:$0xff]  ;;  %vm374_vm2 = vcmask 523264  }
  0x1a   :  { %v54_v31 = vld [vmem:[%s1273_s0 + $0x50] sm:$0xff]  ;;  %v55_v32 = vld [vmem:[%s1273_s0 + $0x58] sm:$0xff]  ;;  %v310_v33 = vld [vmem:[%s1277_s4 + $0x20] sm:$0xff] }
  0x1b   :  { %v311_v34 = vld [vmem:[%s1277_s4 + $0x28] sm:$0xff]  ;;  %v906_v35 = vpack.c.bf16 %v55_v32, %v54_v31  ;;  %v312_v36 = vld [vmem:[%s1277_s4 + $0x30] sm:$0xff]  ;;  %v313_v37 = vld [vmem:[%s1277_s4 + $0x38] sm:$0xff] }
  0x1c   :  { %v56_v38 = vld [vmem:[%s1273_s0 + $0x60] sm:$0xff]  ;;  %v57_v39 = vld [vmem:[%s1273_s0 + $0x68] sm:$0xff]  ;;  %v474_v43 = vld [vmem:[%s1279_s6 + $0x10] sm:$0xff] }
  0x1d   :  { %326 = vperm.xlu0 %926, %v308_v29   ;;  %331 = vperm.xlu1 %927, %v309_v30   ;;  %v472_v40 = vld [vmem:[%s1279_s6] sm:$0xff]  ;;  %v473_v41 = vld [vmem:[%s1279_s6 + $0x8] sm:$0xff]  ;;  %v912_v42 = vpack.c.bf16 %v57_v39, %v56_v38  ;;  %v475_v44 = vld [vmem:[%s1279_s6 + $0x18] sm:$0xff] }
  0x1e   :  { %v58_v45 = vld [vmem:[%s1273_s0 + $0x70] sm:$0xff]  ;;  %v59_v46 = vld [vmem:[%s1273_s0 + $0x78] sm:$0xff]  ;;  %v625_v47 = vld [vmem:[%s1280_s7] sm:$0xff] }
  0x1f   :  { %899 = vmatpush3.bf16.xpose.msk.msra.mxu0 %vm1026_vm1, %v894_v21  ;;  %v626_v48 = vld [vmem:[%s1280_s7 + $0x8] sm:$0xff]  ;;  %v918_v49 = vpack.c.bf16 %v59_v46, %v58_v45  ;;  %v476_v50 = vld [vmem:[%s1279_s6 + $0x20] sm:$0xff]  ;;  %v627_v51 = vld [vmem:[%s1280_s7 + $0x10] sm:$0xff] }
  0x20   :  { %902 = vmatprep.subr.msk.bf16.mxu0 %vm1026_vm1, %v900_v28  ;;  %v477_v52 = vld [vmem:[%s1279_s6 + $0x28] sm:$0xff]  ;;  %v628_v53 = vld [vmem:[%s1280_s7 + $0x18] sm:$0xff]  ;;  %v478_v54 = vld [vmem:[%s1279_s6 + $0x30] sm:$0xff] }
  0x21   :  { %336 = vperm.xlu0 %926, %v310_v33   ;;  %341 = vperm.xlu1 %927, %v311_v34   ;;  %v629_v55 = vld [vmem:[%s1280_s7 + $0x20] sm:$0xff]  ;;  %v479_v56 = vld [vmem:[%s1279_s6 + $0x38] sm:$0xff]  ;;  %v630_v57 = vld [vmem:[%s1280_s7 + $0x28] sm:$0xff] }
  0x22   :  { %v37_v58 = vld [vmem:[%s1274_s1 + $0x8] sm:$0xff]  ;;  %v38_v59 = vld [vmem:[%s1274_s1 + $0x10] sm:$0xff]  ;;  %v632_v61 = vld [vmem:[%s1280_s7 + $0x38] sm:$0xff] }
  0x23   :  { %v631_v60 = vld [vmem:[%s1280_s7 + $0x30] sm:$0xff]  ;;  %v39_v62 = vld [vmem:[%s1274_s1 + $0x18] sm:$0xff]  ;;  %v40_v63 = vld [vmem:[%s1274_s1 + $0x20] sm:$0xff] }
  0x24   :  { %v694_v0 = vld [vmem:[#allocation2] sm:$0x1]  ;;  %v41_v1 = vld [vmem:[%s1274_s1 + $0x28] sm:$0xff]  ;;  %v42_v2 = vld [vmem:[%s1274_s1 + $0x30] sm:$0xff] }
  0x25   :  { %346 = vperm.xlu0 %926, %v312_v36   ;;  %351 = vperm.xlu1 %927, %v313_v37   ;;  %v43_v3 = vld [vmem:[%s1274_s1 + $0x38] sm:$0xff]  ;;  %v928_v4 = vld [vmem:[%s1276_s3] sm:$0xff]  }
  0x26   :  { %852 = vmatprep.mubr.msk.bf16.mxu1 %vm374_vm2, %v928_v4 }
  0x27   :  { %905 = vmatpush3.bf16.xpose.msk.msra.mxu0 %vm1026_vm1, %v900_v28 }
  0x28   :  { %908 = vmatprep.subr.msk.bf16.mxu0 %vm1026_vm1, %v906_v35 }
  0x29   :  { %482 = vperm.xlu0 %926, %v472_v40   ;;  %487 = vperm.xlu1 %927, %v473_v41   ;;  %v929_v41 = vld [vmem:[%s1276_s3 + $0x8] sm:$0xff]  }
  0x2d   :  { %492 = vperm.xlu0 %926, %v474_v43   ;;  %497 = vperm.xlu1 %927, %v475_v44   ;;  %v931_v43 = vld [vmem:[%s1276_s3 + $0x18] sm:$0xff]   ;;  %v932_v44 = vld [vmem:[%s1278_s5] sm:$0xff]  }
  0x2f   :  { %911 = vmatpush3.bf16.xpose.msk.msra.mxu0 %vm1026_vm1, %v906_v35 }
  0x30   :  { %914 = vmatprep.subr.msk.bf16.mxu0 %vm1026_vm1, %v912_v42 }
  0x31   :  { %635 = vperm.xlu0 %926, %v625_v47   ;;  %640 = vperm.xlu1 %927, %v626_v48  }
  0x35   :  { %502 = vperm.xlu0 %926, %v476_v50   ;;  %645 = vperm.xlu1 %927, %v627_v51  }
  0x37   :  { %917 = vmatpush3.bf16.xpose.msk.msra.mxu0 %vm1026_vm1, %v912_v42  ;;  %v930_v42 = vld [vmem:[%s1276_s3 + $0x10] sm:$0xff]  }
  0x38   :  { %920 = vmatprep.subr.msk.bf16.mxu0 %vm1026_vm1, %v918_v49 }
  0x39   :  { %507 = vperm.xlu0 %926, %v477_v52   ;;  %650 = vperm.xlu1 %927, %v628_v53  }
  0x3d   :  { %512 = vperm.xlu0 %926, %v478_v54   ;;  %655 = vperm.xlu1 %927, %v629_v55  }
  0x3f   :  { %923 = vmatpush3.bf16.xpose.msk.msra.mxu0 %vm1026_vm1, %v918_v49 }
  0x41   :  { %517 = vperm.xlu0 %926, %v479_v56   ;;  %660 = vperm.xlu1 %927, %v630_v57  }
  0x45   :  { %665 = vperm.xlu0 %926, %v631_v60   ;;  %670 = vperm.xlu1 %927, %v632_v61  }
  0x46   :  { %833 = vmatmul.mubr.msk.f32.vlgmr.msra.gmra.mrb[0].mxu0 %vm108_vm0, %v37_v58 }
  0x47   :  { %835 = vmatprep.mubr.msk.f32.mxu0 %vm108_vm0, %v38_v59 }
  0x49   :  { %697 = vperm.xlu0 %926, %v694_v0  }
  0x4a   :  { %836 = vmatmul.mubr.msk.f32.gmra.mrb[2].mxu0 %vm108_vm0, %v39_v62 }
  0x4b   :  { %838 = vmatprep.mubr.msk.f32.mxu0 %vm108_vm0, %v40_v63 }
  0x4e   :  { %839 = vmatmul.mubr.msk.f32.gmra.mrb[4].mxu0 %vm108_vm0, %v41_v1 }
  0x4f   :  { %841 = vmatprep.mubr.msk.f32.mxu0 %vm108_vm0, %v42_v2 }
  0x52   :  { %842 = vmatmul.mubr.msk.f32.gmra.mrb[6].mxu0 %vm108_vm0, %v43_v3 }
  0x85   :  { %v81_v6 = vpop.permute.xlu1 %80 }
  0x86   :  { %v71_v5 = vpop.permute.xlu0 %70 }
  0x89   :  { %v86_v8 = vpop.permute.xlu1 %85 }
  0x8a   :  { %v76_v7 = vpop.permute.xlu0 %75 }
  0x8d   :  { %v96_v18 = vpop.permute.xlu1 %95 }
  0x8e   :  { %v91_v21 = vpop.permute.xlu0 %90 }
  0x91   :  { %v106_v30 = vpop.permute.xlu1 %105 }
  0x92   :  { %v101_v33 = vpop.permute.xlu0 %100 }
  0x98   :  { %v317_v45 = vpop.permute.xlu0 %316  ;;  %v322_v46 = vpop.permute.xlu1 %321 }
  0x9c   :  { %v327_v47 = vpop.permute.xlu0 %326  ;;  %v332_v48 = vpop.permute.xlu1 %331 }
  0xa0   :  { %v337_v52 = vpop.permute.xlu0 %336  ;;  %v342_v57 = vpop.permute.xlu1 %341 }
  0xa4   :  { %v347_v0 = vpop.permute.xlu0 %346 }
 0x119   :  { %v834_v9 = vpop.f32.mrb[0].mxu0 }
 0x11a   :  { %v253_v10 = vadd.f32 %v834_v9, %v76_v7  ;;  %v247_v11 = vpop.f32.mrb[1].mxu0 }
 0x11b   :  { %v248_v12 = vadd.f32 %v247_v11, %v71_v5  ;;  %v352_v5 = vpop.permute.xlu1 %351 }
 0x11c   :  { %v287_v13 = vmax.f32 %v253_v10, 0.0 }
 0x11d   :  { %v286_v14 = vmax.f32 %v248_v12, 0.0  ;;  %v837_v15 = vpop.f32.mrb[2].mxu0 }
 0x11e   :  { %v263_v16 = vadd.f32 %v837_v15, %v86_v8  ;;  %v257_v17 = vpop.f32.mrb[3].mxu0 }
 0x11f   :  { %v258_v19 = vadd.f32 %v257_v17, %v81_v6  ;;  %v294_v20 = vpack.c.bf16 %v287_v13, %v286_v14  ;;  %v933_v17 = vld [vmem:[%s1278_s5 + $0x8] sm:$0xff]  }
 0x120   :  { %v289_v22 = vmax.f32 %v263_v16, 0.0 }
 0x121   :  { %v288_v23 = vmax.f32 %v258_v19, 0.0  ;;  %v840_v24 = vpop.f32.mrb[4].mxu0  ;;  %844 = vmatprep.subr.bf16.mxu1 %v294_v20  ;;  %v935_v19 = vld [vmem:[%s1278_s5 + $0x18] sm:$0xff]  }
 0x122   :  { %v273_v25 = vadd.f32 %v840_v24, %v96_v18  ;;  %v267_v26 = vpop.f32.mrb[5].mxu0  ;;  %845 = vmatpush3.bf16.msra.mxu1 %v294_v20  ;;  %v934_v18 = vld [vmem:[%s1278_s5 + $0x10] sm:$0xff]   ;;  %v483_v20 = vpop.permute.xlu0 %482  ;;  %s961_s5 = smov [#allocation3]  }
 0x123   :  { %v295_v27 = vpack.c.bf16 %v289_v22, %v288_v23  ;;  %v268_v28 = vadd.f32 %v267_v26, %v91_v21  ;;  %v488_v21 = vpop.permute.xlu1 %487  ;;  %s712_s16 = sshll.u32 %s961_s5, 4  ;;  %s713_s16 = int_to_ptr.vmem [resolvable:$true] %s712_s16 }
 0x124   :  { %v291_v29 = vmax.f32 %v273_v25, 0.0  ;;  %s936_s6 = scalar_lea.vmem %s713_s16, 16  ;;  %s940_s8 = scalar_lea.vmem %s713_s16, 32 }
 0x125   :  { %v290_v31 = vmax.f32 %v268_v28, 0.0  ;;  %v843_v32 = vpop.f32.mrb[6].mxu0  ;;  %846 = vmatprep.subr.bf16.mxu1 %v295_v27  ;;  %p937_p0 = scmp.ne.s32.totalorder %s713_s16, %s936_s6  ;;  %p941_p1 = scmp.lt.s32.totalorder %s713_s16, %s713_s16 }
 0x126   :  { %v283_v34 = vadd.f32 %v843_v32, %v106_v30  ;;  %v277_v35 = vpop.f32.mrb[7].mxu0  ;;  %847 = vmatpush3.bf16.msra.mxu1 %v295_v27  ;;  %v493_v22 = vpop.permute.xlu0 %492  ;;  %p942_p2 = scmp.lt.s32.totalorder %s940_s8, %s936_s6 }
 0x127   :  { %v296_v36 = vpack.c.bf16 %v291_v29, %v290_v31  ;;  %v278_v37 = vadd.f32 %v277_v35, %v101_v33  ;;  %v498_v23 = vpop.permute.xlu1 %497 }
 0x128   :  { %v293_v38 = vmax.f32 %v283_v34, 0.0  ;;  %p943_p3 = por %p942_p2, %p941_p1 }
 0x129   :  { %v292_v39 = vmax.f32 %v278_v37, 0.0  ;;  %848 = vmatprep.subr.bf16.mxu1 %v296_v36 }
 0x12a   :  { %849 = vmatpush3.bf16.msra.mxu1 %v296_v36  ;;  %v636_v24 = vpop.permute.xlu0 %635  ;;  %p944_p4 = pnand %p943_p3, %p937_p0 }
 0x12b   :  { %v297_v40 = vpack.c.bf16 %v293_v38, %v292_v39  ;;  %v641_v25 = vpop.permute.xlu1 %640 }
 0x12d   :  { %850 = vmatprep.subr.bf16.mxu1 %v297_v40 }
 0x12e   :  { %851 = vmatpush3.bf16.msra.mxu1 %v297_v40  ;;  %v503_v26 = vpop.permute.xlu0 %502 }
 0x12f   :  { %v646_v27 = vpop.permute.xlu1 %645 }
 0x131   :  { %853 = vmatmul.mubr.msk.bf16.vlgmr.msra.gmra.mrb[0].mxu1 %vm374_vm2, %v929_v41 }
 0x132   :  { %856 = vmatprep.mubr.msk.bf16.mxu1 %vm374_vm2, %v930_v42  ;;  %v508_v28 = vpop.permute.xlu0 %507 }
 0x133   :  { %v651_v30 = vpop.permute.xlu1 %650 }
 0x136   :  { %v513_v39 = vpop.permute.xlu0 %512 }
 0x137   :  { %v656_v42 = vpop.permute.xlu1 %655 }
 0x139   :  { %857 = vmatmul.mubr.msk.bf16.gmra.mrb[4].mxu1 %vm374_vm2, %v931_v43 }
 0x13a   :  { %868 = vmatprep.mubr.msk.bf16.mxu1 %vm374_vm2, %v932_v44 }
 0x204   :  { %v854_v49 = vpop.f32.mrb[0].mxu1 }
 0x205   :  { %v430_v50 = vadd.f32 %v854_v49, %v327_v47  ;;  %v421_v51 = vpop.f32.mrb[1].mxu1 }
 0x206   :  { %v422_v53 = vadd.f32 %v421_v51, %v317_v45  ;;  %v855_v54 = vpop.f32.mrb[2].mxu1 }
 0x207   :  { %v433_v55 = vadd.f32 %v855_v54, %v332_v48  ;;  %v424_v56 = vpop.f32.mrb[3].mxu1  ;;  %v454_v59 = vmax.f32 %v430_v50, 0.0 }
 0x208   :  { %v425_v58 = vadd.f32 %v424_v56, %v322_v46  ;;  %v452_v61 = vmax.f32 %v422_v53, 0.0  ;;  %v518_v53 = vpop.permute.xlu0 %517 }
 0x209   :  { %v455_v60 = vmax.f32 %v433_v55, 0.0 }
 0x20a   :  { %v453_v62 = vmax.f32 %v425_v58, 0.0 }
 0x20b   :  { %v461_v63 = vpack.c.bf16 %v455_v60, %v454_v59  ;;  %v661_v60 = vpop.permute.xlu1 %660 }
 0x20c   :  { %v460_v1 = vpack.c.bf16 %v453_v62, %v452_v61  ;;  %v858_v2 = vpop.f32.mrb[4].mxu1 }
 0x20d   :  { %v446_v3 = vadd.f32 %v858_v2, %v347_v0  ;;  %v437_v4 = vpop.f32.mrb[5].mxu1 }
 0x20e   :  { %v438_v6 = vadd.f32 %v437_v4, %v337_v52  ;;  %v859_v7 = vpop.f32.mrb[6].mxu1  ;;  %860 = vmatprep.subr.bf16.mxu1 %v460_v1  ;;  %v666_v4 = vpop.permute.xlu0 %665 }
 0x20f   :  { %v449_v8 = vadd.f32 %v859_v7, %v352_v5  ;;  %v440_v9 = vpop.f32.mrb[7].mxu1  ;;  %861 = vmatpush3.bf16.msra.mxu1 %v460_v1  ;;  %v458_v11 = vmax.f32 %v446_v3, 0.0  ;;  %v671_v7 = vpop.permute.xlu1 %670 }
 0x210   :  { %v441_v10 = vadd.f32 %v440_v9, %v342_v57  ;;  %862 = vmatprep.subr.bf16.mxu1 %v461_v63  ;;  %v456_v13 = vmax.f32 %v438_v6, 0.0 }
 0x211   :  { %v459_v12 = vmax.f32 %v449_v8, 0.0 }
 0x212   :  { %v457_v14 = vmax.f32 %v441_v10, 0.0  ;;  %v700_v10 = vlaneseq }
 0x213   :  { %v463_v15 = vpack.c.bf16 %v459_v12, %v458_v11  ;;  %863 = vmatpush3.bf16.msra.mxu1 %v461_v63 }
 0x214   :  { %v462_v16 = vpack.c.bf16 %v457_v14, %v456_v13  ;;  %v701_v13 = vshrl.u32 %v700_v10, 7 }
 0x216   :  { %864 = vmatprep.subr.bf16.mxu1 %v462_v16 }
 0x217   :  { %865 = vmatpush3.bf16.msra.mxu1 %v462_v16  ;;  %v702_v16 = vsub.s32 0, %v701_v13 }
 0x218   :  { %866 = vmatprep.subr.bf16.mxu1 %v463_v15 }
 0x21b   :  { %867 = vmatpush3.bf16.msra.mxu1 %v463_v15 }
 0x21e   :  { %869 = vmatmul.mubr.msk.bf16.vlgmr.msra.gmra.mrb[8].mxu1 %vm374_vm2, %v933_v17 }
 0x21f   :  { %872 = vmatprep.mubr.msk.bf16.mxu1 %vm374_vm2, %v934_v18  ;;  %v698_v18 = vpop.permute.xlu0 %697 }
 0x226   :  { %873 = vmatmul.mubr.msk.bf16.gmra.mrb[12].mxu1 %vm374_vm2, %v935_v19 }
 0x2f1   :  { %v870_v29 = vpop.f32.mrb[8].mxu1 }
 0x2f2   :  { %v586_v31 = vpop.f32.mrb[9].mxu1  ;;  %v595_v32 = vadd.f32 %v870_v29, %v493_v22 }
 0x2f3   :  { %v587_v33 = vadd.f32 %v586_v31, %v483_v20  ;;  %v871_v34 = vpop.f32.mrb[10].mxu1  ;;  %v703_v20 = vrot.slane %v698_v18, %v702_v16 }
 0x2f4   :  { %v598_v35 = vadd.f32 %v871_v34, %v498_v23  ;;  %v589_v36 = vpop.f32.mrb[11].mxu1  ;;  %v619_v40 = vmax.f32 %v595_v32, 0.0 }
 0x2f5   :  { %v617_v37 = vmax.f32 %v587_v33, 0.0  ;;  %v590_v38 = vadd.f32 %v589_v36, %v488_v21 }
 0x2f6   :  { %v620_v43 = vmax.f32 %v598_v35, 0.0  ;;  %v675_v48 = vmul.f32 %v646_v27, %v619_v40 }
 0x2f7   :  { %v618_v41 = vmax.f32 %v590_v38, 0.0  ;;  %v673_v44 = vmul.f32 %v636_v24, %v617_v37 }
 0x2f8   :  { %v676_v54 = vmul.f32 %v651_v30, %v620_v43 }
 0x2f9   :  { %v674_v45 = vmul.f32 %v641_v25, %v618_v41  ;;  %v874_v46 = vpop.f32.mrb[12].mxu1 }
 0x2fa   :  { %v602_v47 = vpop.f32.mrb[13].mxu1  ;;  %v611_v50 = vadd.f32 %v874_v46, %v513_v39 }
 0x2fb   :  { %v681_v49 = vadd.f32 %v674_v45, %v673_v44  ;;  %v603_v51 = vadd.f32 %v602_v47, %v503_v26  ;;  %v875_v52 = vpop.f32.mrb[14].mxu1 }
 0x2fc   :  { %v605_v55 = vpop.f32.mrb[15].mxu1  ;;  %v614_v58 = vadd.f32 %v875_v52, %v518_v53  ;;  %v623_v61 = vmax.f32 %v611_v50, 0.0 }
 0x2fd   :  { %v682_v56 = vadd.f32 %v681_v49, %v675_v48  ;;  %v621_v57 = vmax.f32 %v603_v51, 0.0  ;;  %v606_v59 = vadd.f32 %v605_v55, %v508_v28 }
 0x2fe   :  { %v624_v2 = vmax.f32 %v614_v58, 0.0  ;;  %v679_v5 = vmul.f32 %v666_v4, %v623_v61 }
 0x2ff   :  { %v677_v62 = vmul.f32 %v656_v42, %v621_v57  ;;  %v683_v63 = vadd.f32 %v682_v56, %v676_v54  ;;  %v622_v0 = vmax.f32 %v606_v59, 0.0 }
 0x300   :  { %v680_v8 = vmul.f32 %v671_v7, %v624_v2 }
 0x301   :  { %v684_v1 = vadd.f32 %v683_v63, %v677_v62  ;;  %v678_v3 = vmul.f32 %v661_v60, %v622_v0 }
 0x303   :  { %v685_v6 = vadd.f32 %v684_v1, %v678_v3 }
 0x305   :  { %v686_v9 = vadd.f32 %v685_v6, %v679_v5 }
 0x307   :  { %v687_v11 = vadd.f32 %v686_v9, %v680_v8 }
 0x309   :  { %v688_v12 = vrot.slane %v687_v11, 4 }
 0x30b   :  { %v689_v14 = vadd.f32 %v688_v12, %v687_v11 }
 0x30d   :  { %v690_v15 = vrot.slane %v689_v14, 2 }
 0x30f   :  { %v691_v17 = vadd.f32 %v690_v15, %v689_v14 }
 0x311   :  { %v692_v19 = vrot.slane %v691_v17, 1 }
 0x313   :  { %v693_v21 = vadd.f32 %v692_v19, %v691_v17 }
 0x315   :  { %v704_v22 = vadd.f32 %v703_v20, %v693_v21 }
 0x317   :  { %705 = vst [vmem:[#allocation3] sm:$0x1] %v704_v22 }
 0x318   :  { %947 = shalt.err (!%p944_p4)
}
 0x319   :  { %s948_s19 = scalar_lea.hbm %s1282_s9, 16 }
 0x31a   :  { %p949_p5 = scmp.ne.s32.totalorder %s1282_s9, %s948_s19  ;;  %p952_p6 = scmp.lt.u32.totalorder %s948_s19, %s1282_s9 }
 0x31c   :  { %p954_p7 = pnand %p952_p6, %p949_p5 }
 0x31e   :  { %957 = shalt.err (!%p954_p7)
}
 0x31f   :  { %715 = dma.vmem_to_hbm [thread:$0]  %s713_s16, 16, %s1282_s9, [#allocation4]  }
 0x320   :  { %958 = dma.done.wait [#allocation4], 16  }
 0x321   :  { %959 = vsyncadd [#allocation4], 4294967280 }
 0x322   :  { %719 = vsyncpa [#allocation4], 1 }

// kernel: tpu_custom_call.1
= control target key start
LH: loop header
LB: loop body
LE: loop exit
PB: predicated region body
PF: predicated region fallthrough
CT: control target
= control target key end

     0   :  { %s1023_s0 = inlined_call_operand.vmem [shape: f32[4,128], index: 0, kind: input, shape index: {}]   ;;  %s1024_s1 = inlined_call_operand.vmem [shape: f32[64,4], index: 1, kind: input, shape index: {}]   ;;  %s1025_s2 = inlined_call_operand.vmem [shape: f32[64,1], index: 2, kind: input, shape index: {}]   ;;  %s1026_s3 = inlined_call_operand.vmem [shape: bf16[64,64], index: 3, kind: input, shape index: {}]   ;;  %s1027_s4 = inlined_call_operand.vmem [shape: f32[64,1], index: 4, kind: input, shape index: {}]   ;;  %s1028_s5 = inlined_call_operand.vmem [shape: bf16[64,64], index: 5, kind: input, shape index: {}]   ;;  %s1029_s6 = inlined_call_operand.vmem [shape: f32[64,1], index: 6, kind: input, shape index: {}]   ;;  %s1030_s7 = inlined_call_operand.vmem [shape: f32[64,1], index: 7, kind: input, shape index: {}]   ;;  %s1031_s8 = inlined_call_operand.<no memory space> [shape: f32[1,1], index: 8, kind: input, shape index: {}]   ;;  %s1032_s9 = inlined_call_operand.hbm [shape: f32[1,128], index: 9, kind: output, shape index: {}]  }
   0x1   :  { %v14_v0 = vstv %s1031_s8 }
   0x2   :  { %15 = vst [vmem:[#allocation2] sm:$0x1] %v14_v0 }
   0x3   :  { %v44_v1 = vld [vmem:[%s1023_s0] sm:$0xf]  ;;  %vm118_vm0 = vcmask 1043456   ;;  %vm93_vm1 = vcmask 31744   ;;  %v37_v3 = vld [vmem:[%s1024_s1 + $0x8] sm:$0xff]  ;;  %v38_v4 = vld [vmem:[%s1024_s1 + $0x10] sm:$0xff] }
   0x4   :  { %v36_v2 = vld [vmem:[%s1024_s1] sm:$0xff]  ;;  %711 = vmatprep.subr.msk.mxu0 %vm118_vm0, %v44_v1  ;;  %v793_v5 = vmov 0   ;;  %v47_v7 = vld [vmem:[%s1025_s2 + $0x10] sm:$0xff]  ;;  %v39_v8 = vld [vmem:[%s1024_s1 + $0x18] sm:$0xff] }
   0x5   :  { %713 = vmatprep.mubr.msk.f32.mxu0 %vm93_vm1, %v36_v2  ;;  %712 = vmatpush3.msk.msra.mxu0 %vm118_vm0, %v44_v1  ;;  %v45_v6 = vld [vmem:[%s1025_s2] sm:$0xff]  ;;  %v46_v10 = vld [vmem:[%s1025_s2 + $0x8] sm:$0xff]  ;;  %v48_v11 = vld [vmem:[%s1025_s2 + $0x18] sm:$0xff] }
   0x6   :  { %759 = vset.pattern.permute.xlu0 %v793_v5  ;;  %714 = vmatmul.mubr.msk.f32.vlgmr.msra.gmra.mrb[0].mxu0 %vm93_vm1, %v37_v3  ;;  %v40_v9 = vld [vmem:[%s1024_s1 + $0x20] sm:$0xff]  ;;  %v41_v12 = vld [vmem:[%s1024_s1 + $0x28] sm:$0xff]  ;;  %v42_v13 = vld [vmem:[%s1024_s1 + $0x30] sm:$0xff] }
   0x7   :  { %760 = vset.pattern.permute.xlu1 %v793_v5  ;;  %716 = vmatprep.mubr.msk.f32.mxu0 %vm93_vm1, %v38_v4  ;;  %v49_v14 = vld [vmem:[%s1025_s2 + $0x20] sm:$0xff]  ;;  %v50_v15 = vld [vmem:[%s1025_s2 + $0x28] sm:$0xff]  ;;  %v43_v16 = vld [vmem:[%s1024_s1 + $0x38] sm:$0xff] }
   0x8   :  { %55 = vperm.xlu0 %759, %v45_v6   ;;  %65 = vperm.xlu1 %760, %v47_v7   ;;  %v51_v17 = vld [vmem:[%s1025_s2 + $0x30] sm:$0xff]  ;;  %v52_v18 = vld [vmem:[%s1025_s2 + $0x38] sm:$0xff]  ;;  %v247_v19 = vld [vmem:[%s1027_s4] sm:$0xff] }
   0x9   :  { %v248_v20 = vld [vmem:[%s1027_s4 + $0x8] sm:$0xff] }
   0xa   :  { %717 = vmatmul.mubr.msk.f32.gmra.mrb[2].mxu0 %vm93_vm1, %v39_v8 }
   0xb   :  { %719 = vmatprep.mubr.msk.f32.mxu0 %vm93_vm1, %v40_v9 }
   0xc   :  { %60 = vperm.xlu0 %759, %v46_v10   ;;  %70 = vperm.xlu1 %760, %v48_v11  }
   0xe   :  { %720 = vmatmul.mubr.msk.f32.gmra.mrb[4].mxu0 %vm93_vm1, %v41_v12 }
   0xf   :  { %722 = vmatprep.mubr.msk.f32.mxu0 %vm93_vm1, %v42_v13 }
  0x10   :  { %75 = vperm.xlu0 %759, %v49_v14   ;;  %80 = vperm.xlu1 %760, %v50_v15  }
  0x12   :  { %723 = vmatmul.mubr.msk.f32.gmra.mrb[6].mxu0 %vm93_vm1, %v43_v16 }
  0x14   :  { %85 = vperm.xlu0 %759, %v51_v17   ;;  %90 = vperm.xlu1 %760, %v52_v18  }
  0x15   :  { %16 = vsyncpa [#allocation4], 0  ;;  %v249_v21 = vld [vmem:[%s1027_s4 + $0x10] sm:$0xff]  ;;  %v250_v22 = vld [vmem:[%s1027_s4 + $0x18] sm:$0xff]  ;;  %vm315_vm2 = vcmask 523264  }
  0x16   :  { %v251_v23 = vld [vmem:[%s1027_s4 + $0x20] sm:$0xff]  ;;  %v252_v24 = vld [vmem:[%s1027_s4 + $0x28] sm:$0xff]  ;;  %v253_v25 = vld [vmem:[%s1027_s4 + $0x30] sm:$0xff] }
  0x17   :  { %v254_v26 = vld [vmem:[%s1027_s4 + $0x38] sm:$0xff]  ;;  %v413_v27 = vld [vmem:[%s1029_s6] sm:$0xff]  ;;  %v414_v28 = vld [vmem:[%s1029_s6 + $0x8] sm:$0xff] }
  0x18   :  { %257 = vperm.xlu0 %759, %v247_v19   ;;  %262 = vperm.xlu1 %760, %v248_v20   ;;  %v415_v29 = vld [vmem:[%s1029_s6 + $0x10] sm:$0xff]  ;;  %v416_v30 = vld [vmem:[%s1029_s6 + $0x18] sm:$0xff]  ;;  %v566_v31 = vld [vmem:[%s1030_s7] sm:$0xff] }
  0x19   :  { %v567_v32 = vld [vmem:[%s1030_s7 + $0x8] sm:$0xff]  ;;  %v417_v33 = vld [vmem:[%s1029_s6 + $0x20] sm:$0xff]  ;;  %v568_v34 = vld [vmem:[%s1030_s7 + $0x10] sm:$0xff] }
  0x1a   :  { %v418_v35 = vld [vmem:[%s1029_s6 + $0x28] sm:$0xff]  ;;  %v569_v36 = vld [vmem:[%s1030_s7 + $0x18] sm:$0xff]  ;;  %v419_v37 = vld [vmem:[%s1029_s6 + $0x30] sm:$0xff] }
  0x1b   :  { %v570_v38 = vld [vmem:[%s1030_s7 + $0x20] sm:$0xff]  ;;  %v420_v39 = vld [vmem:[%s1029_s6 + $0x38] sm:$0xff]  ;;  %v571_v40 = vld [vmem:[%s1030_s7 + $0x28] sm:$0xff] }
  0x1c   :  { %267 = vperm.xlu0 %759, %v249_v21   ;;  %272 = vperm.xlu1 %760, %v250_v22   ;;  %v572_v41 = vld [vmem:[%s1030_s7 + $0x30] sm:$0xff]  ;;  %v573_v42 = vld [vmem:[%s1030_s7 + $0x38] sm:$0xff]  ;;  %v635_v43 = vld [vmem:[#allocation2] sm:$0x1] }
  0x1d   :  { %v761_v44 = vld [vmem:[%s1026_s3] sm:$0xff]   ;;  %v762_v17 = vld [vmem:[%s1026_s3 + $0x8] sm:$0xff]   ;;  %v763_v18 = vld [vmem:[%s1026_s3 + $0x10] sm:$0xff]  }
  0x1e   :  { %733 = vmatprep.mubr.msk.bf16.mxu1 %vm315_vm2, %v761_v44  ;;  %v764_v19 = vld [vmem:[%s1026_s3 + $0x18] sm:$0xff]   ;;  %v765_v20 = vld [vmem:[%s1028_s5] sm:$0xff]  }
  0x1f   :  { %749 = vmatprep.mubr.msk.bf16.mxu0 %vm315_vm2, %v765_v20 }
  0x20   :  { %277 = vperm.xlu0 %759, %v251_v23   ;;  %282 = vperm.xlu1 %760, %v252_v24  }
  0x24   :  { %287 = vperm.xlu0 %759, %v253_v25   ;;  %292 = vperm.xlu1 %760, %v254_v26  }
  0x28   :  { %423 = vperm.xlu0 %759, %v413_v27   ;;  %428 = vperm.xlu1 %760, %v414_v28  }
  0x2c   :  { %433 = vperm.xlu0 %759, %v415_v29   ;;  %438 = vperm.xlu1 %760, %v416_v30  }
  0x30   :  { %576 = vperm.xlu0 %759, %v566_v31   ;;  %581 = vperm.xlu1 %760, %v567_v32  }
  0x34   :  { %443 = vperm.xlu0 %759, %v417_v33   ;;  %586 = vperm.xlu1 %760, %v568_v34  }
  0x38   :  { %448 = vperm.xlu0 %759, %v418_v35   ;;  %591 = vperm.xlu1 %760, %v569_v36  }
  0x3c   :  { %453 = vperm.xlu0 %759, %v419_v37   ;;  %596 = vperm.xlu1 %760, %v570_v38  }
  0x40   :  { %458 = vperm.xlu0 %759, %v420_v39   ;;  %601 = vperm.xlu1 %760, %v571_v40  }
  0x44   :  { %606 = vperm.xlu0 %759, %v572_v41   ;;  %611 = vperm.xlu1 %760, %v573_v42  }
  0x48   :  { %638 = vperm.xlu0 %759, %v635_v43  }
  0x87   :  { %v56_v45 = vpop.permute.xlu0 %55  ;;  %v66_v46 = vpop.permute.xlu1 %65 }
  0x8b   :  { %v61_v47 = vpop.permute.xlu0 %60  ;;  %v71_v48 = vpop.permute.xlu1 %70 }
  0x8f   :  { %v81_v58 = vpop.permute.xlu1 %80  ;;  %v76_v61 = vpop.permute.xlu0 %75 }
  0x93   :  { %v91_v6 = vpop.permute.xlu1 %90  ;;  %v86_v9 = vpop.permute.xlu0 %85 }
  0x97   :  { %v258_v21 = vpop.permute.xlu0 %257  ;;  %v263_v22 = vpop.permute.xlu1 %262 }
  0x9b   :  { %v268_v23 = vpop.permute.xlu0 %267  ;;  %v273_v24 = vpop.permute.xlu1 %272 }
  0x9f   :  { %v278_v28 = vpop.permute.xlu0 %277  ;;  %v283_v33 = vpop.permute.xlu1 %282 }
  0xa3   :  { %v288_v40 = vpop.permute.xlu0 %287 }
  0xd9   :  { %v715_v49 = vpop.f32.mrb[0].mxu0 }
  0xda   :  { %v194_v50 = vadd.f32 %v715_v49, %v61_v47  ;;  %v188_v51 = vpop.f32.mrb[1].mxu0 }
  0xdb   :  { %v189_v52 = vadd.f32 %v188_v51, %v56_v45  ;;  %v293_v45 = vpop.permute.xlu1 %292 }
  0xdc   :  { %v228_v53 = vmax.f32 %v194_v50, 0.0 }
  0xdd   :  { %v227_v54 = vmax.f32 %v189_v52, 0.0  ;;  %v718_v55 = vpop.f32.mrb[2].mxu0 }
  0xde   :  { %v204_v56 = vadd.f32 %v718_v55, %v71_v48  ;;  %v198_v57 = vpop.f32.mrb[3].mxu0 }
  0xdf   :  { %v199_v59 = vadd.f32 %v198_v57, %v66_v46  ;;  %v235_v60 = vpack.c.bf16 %v228_v53, %v227_v54  ;;  %v766_v57 = vld [vmem:[%s1028_s5 + $0x8] sm:$0xff]  }
  0xe0   :  { %v230_v62 = vmax.f32 %v204_v56, 0.0 }
  0xe1   :  { %v229_v63 = vmax.f32 %v199_v59, 0.0  ;;  %v721_v0 = vpop.f32.mrb[4].mxu0  ;;  %725 = vmatprep.subr.bf16.mxu1 %v235_v60  ;;  %v768_v59 = vld [vmem:[%s1028_s5 + $0x18] sm:$0xff]  }
  0xe2   :  { %v214_v1 = vadd.f32 %v721_v0, %v81_v58  ;;  %v208_v2 = vpop.f32.mrb[5].mxu0  ;;  %726 = vmatpush3.bf16.msra.mxu1 %v235_v60  ;;  %v767_v58 = vld [vmem:[%s1028_s5 + $0x10] sm:$0xff]   ;;  %v424_v60 = vpop.permute.xlu0 %423  ;;  %s794_s5 = smov [#allocation3]  }
  0xe3   :  { %v236_v3 = vpack.c.bf16 %v230_v62, %v229_v63  ;;  %v209_v4 = vadd.f32 %v208_v2, %v76_v61  ;;  %v429_v61 = vpop.permute.xlu1 %428  ;;  %s653_s27 = sshll.u32 %s794_s5, 4  ;;  %s654_s27 = int_to_ptr.vmem [resolvable:$true] %s653_s27 }
  0xe4   :  { %v232_v5 = vmax.f32 %v214_v1, 0.0  ;;  %s769_s28 = scalar_lea.vmem %s654_s27, 16  ;;  %s773_s29 = scalar_lea.vmem %s654_s27, 32 }
  0xe5   :  { %v231_v7 = vmax.f32 %v209_v4, 0.0  ;;  %v724_v8 = vpop.f32.mrb[6].mxu0  ;;  %727 = vmatprep.subr.bf16.mxu1 %v236_v3  ;;  %p770_p0 = scmp.ne.s32.totalorder %s654_s27, %s769_s28  ;;  %p774_p1 = scmp.lt.s32.totalorder %s654_s27, %s654_s27 }
  0xe6   :  { %v224_v10 = vadd.f32 %v724_v8, %v91_v6  ;;  %v218_v11 = vpop.f32.mrb[7].mxu0  ;;  %728 = vmatpush3.bf16.msra.mxu1 %v236_v3  ;;  %v434_v62 = vpop.permute.xlu0 %433  ;;  %p775_p2 = scmp.lt.s32.totalorder %s773_s29, %s769_s28 }
  0xe7   :  { %v237_v12 = vpack.c.bf16 %v232_v5, %v231_v7  ;;  %v219_v13 = vadd.f32 %v218_v11, %v86_v9  ;;  %v439_v63 = vpop.permute.xlu1 %438 }
  0xe8   :  { %v234_v14 = vmax.f32 %v224_v10, 0.0  ;;  %p776_p3 = por %p775_p2, %p774_p1 }
  0xe9   :  { %v233_v15 = vmax.f32 %v219_v13, 0.0  ;;  %729 = vmatprep.subr.bf16.mxu1 %v237_v12 }
  0xea   :  { %730 = vmatpush3.bf16.msra.mxu1 %v237_v12  ;;  %v577_v0 = vpop.permute.xlu0 %576  ;;  %p777_p4 = pnand %p776_p3, %p770_p0 }
  0xeb   :  { %v238_v16 = vpack.c.bf16 %v234_v14, %v233_v15  ;;  %v582_v1 = vpop.permute.xlu1 %581 }
  0xed   :  { %731 = vmatprep.subr.bf16.mxu1 %v238_v16 }
  0xee   :  { %732 = vmatpush3.bf16.msra.mxu1 %v238_v16  ;;  %v444_v2 = vpop.permute.xlu0 %443 }
  0xef   :  { %v587_v3 = vpop.permute.xlu1 %586 }
  0xf1   :  { %734 = vmatmul.mubr.msk.bf16.vlgmr.msra.gmra.mrb[0].mxu1 %vm315_vm2, %v762_v17 }
  0xf2   :  { %737 = vmatprep.mubr.msk.bf16.mxu1 %vm315_vm2, %v763_v18  ;;  %v449_v4 = vpop.permute.xlu0 %448 }
  0xf3   :  { %v592_v6 = vpop.permute.xlu1 %591 }
  0xf6   :  { %v454_v15 = vpop.permute.xlu0 %453 }
  0xf7   :  { %v597_v18 = vpop.permute.xlu1 %596 }
  0xf9   :  { %738 = vmatmul.mubr.msk.bf16.gmra.mrb[4].mxu1 %vm315_vm2, %v764_v19 }
 0x1c4   :  { %v735_v25 = vpop.f32.mrb[0].mxu1 }
 0x1c5   :  { %v371_v26 = vadd.f32 %v735_v25, %v268_v23  ;;  %v362_v27 = vpop.f32.mrb[1].mxu1 }
 0x1c6   :  { %v363_v29 = vadd.f32 %v362_v27, %v258_v21  ;;  %v736_v30 = vpop.f32.mrb[2].mxu1 }
 0x1c7   :  { %v374_v31 = vadd.f32 %v736_v30, %v273_v24  ;;  %v365_v32 = vpop.f32.mrb[3].mxu1  ;;  %v395_v35 = vmax.f32 %v371_v26, 0.0 }
 0x1c8   :  { %v366_v34 = vadd.f32 %v365_v32, %v263_v22  ;;  %v393_v37 = vmax.f32 %v363_v29, 0.0  ;;  %v459_v29 = vpop.permute.xlu0 %458 }
 0x1c9   :  { %v396_v36 = vmax.f32 %v374_v31, 0.0 }
 0x1ca   :  { %v394_v38 = vmax.f32 %v366_v34, 0.0 }
 0x1cb   :  { %v402_v39 = vpack.c.bf16 %v396_v36, %v395_v35  ;;  %v602_v36 = vpop.permute.xlu1 %601 }
 0x1cc   :  { %v401_v41 = vpack.c.bf16 %v394_v38, %v393_v37  ;;  %v739_v42 = vpop.f32.mrb[4].mxu1 }
 0x1cd   :  { %v387_v43 = vadd.f32 %v739_v42, %v288_v40  ;;  %v378_v44 = vpop.f32.mrb[5].mxu1 }
 0x1ce   :  { %v379_v46 = vadd.f32 %v378_v44, %v278_v28  ;;  %v740_v47 = vpop.f32.mrb[6].mxu1  ;;  %741 = vmatprep.subr.bf16.mxu0 %v401_v41  ;;  %v607_v44 = vpop.permute.xlu0 %606 }
 0x1cf   :  { %v390_v48 = vadd.f32 %v740_v47, %v293_v45  ;;  %v381_v49 = vpop.f32.mrb[7].mxu1  ;;  %742 = vmatpush3.bf16.msra.mxu0 %v401_v41  ;;  %v399_v51 = vmax.f32 %v387_v43, 0.0  ;;  %v612_v47 = vpop.permute.xlu1 %611 }
 0x1d0   :  { %v382_v50 = vadd.f32 %v381_v49, %v283_v33  ;;  %743 = vmatprep.subr.bf16.mxu0 %v402_v39  ;;  %v397_v53 = vmax.f32 %v379_v46, 0.0 }
 0x1d1   :  { %v400_v52 = vmax.f32 %v390_v48, 0.0 }
 0x1d2   :  { %v398_v54 = vmax.f32 %v382_v50, 0.0  ;;  %v641_v50 = vlaneseq }
 0x1d3   :  { %v404_v55 = vpack.c.bf16 %v400_v52, %v399_v51  ;;  %744 = vmatpush3.bf16.msra.mxu0 %v402_v39 }
 0x1d4   :  { %v403_v56 = vpack.c.bf16 %v398_v54, %v397_v53  ;;  %v642_v53 = vshrl.u32 %v641_v50, 7 }
 0x1d6   :  { %745 = vmatprep.subr.bf16.mxu0 %v403_v56 }
 0x1d7   :  { %746 = vmatpush3.bf16.msra.mxu0 %v403_v56  ;;  %v643_v56 = vsub.s32 0, %v642_v53 }
 0x1d8   :  { %747 = vmatprep.subr.bf16.mxu0 %v404_v55 }
 0x1db   :  { %748 = vmatpush3.bf16.msra.mxu0 %v404_v55 }
 0x1de   :  { %750 = vmatmul.mubr.msk.bf16.vlgmr.msra.gmra.mrb[8].mxu0 %vm315_vm2, %v766_v57 }
 0x1df   :  { %753 = vmatprep.mubr.msk.bf16.mxu0 %vm315_vm2, %v767_v58  ;;  %v639_v58 = vpop.permute.xlu0 %638 }
 0x1e6   :  { %754 = vmatmul.mubr.msk.bf16.gmra.mrb[12].mxu0 %vm315_vm2, %v768_v59 }
 0x2b1   :  { %v751_v5 = vpop.f32.mrb[8].mxu0 }
 0x2b2   :  { %v527_v7 = vpop.f32.mrb[9].mxu0  ;;  %v536_v8 = vadd.f32 %v751_v5, %v434_v62 }
 0x2b3   :  { %v528_v9 = vadd.f32 %v527_v7, %v424_v60  ;;  %v752_v10 = vpop.f32.mrb[10].mxu0  ;;  %v644_v60 = vrot.slane %v639_v58, %v643_v56 }
 0x2b4   :  { %v539_v11 = vadd.f32 %v752_v10, %v439_v63  ;;  %v530_v12 = vpop.f32.mrb[11].mxu0  ;;  %v560_v16 = vmax.f32 %v536_v8, 0.0 }
 0x2b5   :  { %v558_v13 = vmax.f32 %v528_v9, 0.0  ;;  %v531_v14 = vadd.f32 %v530_v12, %v429_v61 }
 0x2b6   :  { %v561_v19 = vmax.f32 %v539_v11, 0.0  ;;  %v616_v24 = vmul.f32 %v587_v3, %v560_v16 }
 0x2b7   :  { %v559_v17 = vmax.f32 %v531_v14, 0.0  ;;  %v614_v20 = vmul.f32 %v577_v0, %v558_v13 }
 0x2b8   :  { %v617_v30 = vmul.f32 %v592_v6, %v561_v19 }
 0x2b9   :  { %v615_v21 = vmul.f32 %v582_v1, %v559_v17  ;;  %v755_v22 = vpop.f32.mrb[12].mxu0 }
 0x2ba   :  { %v543_v23 = vpop.f32.mrb[13].mxu0  ;;  %v552_v26 = vadd.f32 %v755_v22, %v454_v15 }
 0x2bb   :  { %v622_v25 = vadd.f32 %v615_v21, %v614_v20  ;;  %v544_v27 = vadd.f32 %v543_v23, %v444_v2  ;;  %v756_v28 = vpop.f32.mrb[14].mxu0 }
 0x2bc   :  { %v546_v31 = vpop.f32.mrb[15].mxu0  ;;  %v555_v34 = vadd.f32 %v756_v28, %v459_v29  ;;  %v564_v37 = vmax.f32 %v552_v26, 0.0 }
 0x2bd   :  { %v623_v32 = vadd.f32 %v622_v25, %v616_v24  ;;  %v562_v33 = vmax.f32 %v544_v27, 0.0  ;;  %v547_v35 = vadd.f32 %v546_v31, %v449_v4 }
 0x2be   :  { %v565_v42 = vmax.f32 %v555_v34, 0.0  ;;  %v620_v45 = vmul.f32 %v607_v44, %v564_v37 }
 0x2bf   :  { %v618_v38 = vmul.f32 %v597_v18, %v562_v33  ;;  %v624_v39 = vadd.f32 %v623_v32, %v617_v30  ;;  %v563_v40 = vmax.f32 %v547_v35, 0.0 }
 0x2c0   :  { %v621_v48 = vmul.f32 %v612_v47, %v565_v42 }
 0x2c1   :  { %v625_v41 = vadd.f32 %v624_v39, %v618_v38  ;;  %v619_v43 = vmul.f32 %v602_v36, %v563_v40 }
 0x2c3   :  { %v626_v46 = vadd.f32 %v625_v41, %v619_v43 }
 0x2c5   :  { %v627_v49 = vadd.f32 %v626_v46, %v620_v45 }
 0x2c7   :  { %v628_v51 = vadd.f32 %v627_v49, %v621_v48 }
 0x2c9   :  { %v629_v52 = vrot.slane %v628_v51, 4 }
 0x2cb   :  { %v630_v54 = vadd.f32 %v629_v52, %v628_v51 }
 0x2cd   :  { %v631_v55 = vrot.slane %v630_v54, 2 }
 0x2cf   :  { %v632_v57 = vadd.f32 %v631_v55, %v630_v54 }
 0x2d1   :  { %v633_v59 = vrot.slane %v632_v57, 1 }
 0x2d3   :  { %v634_v61 = vadd.f32 %v633_v59, %v632_v57 }
 0x2d5   :  { %v645_v62 = vadd.f32 %v644_v60, %v634_v61 }
 0x2d7   :  { %646 = vst [vmem:[#allocation3] sm:$0x1] %v645_v62 }
 0x2d8   :  { %780 = shalt.err (!%p777_p4)
}
 0x2d9   :  { %s781_s11 = scalar_lea.hbm %s1032_s9, 16 }
 0x2da   :  { %p782_p5 = scmp.ne.s32.totalorder %s1032_s9, %s781_s11  ;;  %p785_p6 = scmp.lt.u32.totalorder %s781_s11, %s1032_s9 }
 0x2dc   :  { %p787_p7 = pnand %p785_p6, %p782_p5 }
 0x2de   :  { %790 = shalt.err (!%p787_p7)
}
 0x2df   :  { %656 = dma.vmem_to_hbm [thread:$0]  %s654_s27, 16, %s1032_s9, [#allocation4]  }
 0x2e0   :  { %791 = dma.done.wait [#allocation4], 16  }
 0x2e1   :  { %792 = vsyncadd [#allocation4], 4294967280 }
 0x2e2   :  { %660 = vsyncpa [#allocation4], 1 }

</bundles_post_ra>
